<compile_context>
chip_gen: v7x
topology: tpu7x:2x2x1
jax: 0.10.0
libtpu: 0.0.40
codegen_flags: <defaults>
</compile_context>

<pallas_src>
import functools
import math

import jax
import jax.numpy as jnp
from jax.experimental import pallas as pl
from jax.experimental.pallas import tpu as pltpu

_GELU_C = math.sqrt(2.0 / math.pi)
_INV_TEMP = 1.0 / 1.66


# -----------------------------------------------------------------------------
# Hardware helpers
# -----------------------------------------------------------------------------
def _round_up(n, m):
    return ((n + m - 1) // m) * m


def _vmem_capacity_bytes():
    try:
        return int(pltpu.get_tpu_info().vmem_capacity_bytes)
    except Exception:
        return 64 << 20  # assume the smallest (v7x per-TC VMEM) when unknown


def _has_bf16_vpu():
    # v6e / v7x have bf16 VALU & EUP; v5x and older do not.
    try:
        kind = jax.devices()[0].device_kind.lower()
        return not any(t in kind for t in ("v2", "v3", "v4", "v5"))
    except Exception:
        return True


# -----------------------------------------------------------------------------
# Kernel 1: gating / router head.  logits = x @ Wg + bg  (softmax in glue)
# -----------------------------------------------------------------------------
def _gate_kernel(x_ref, wg_ref, bg_ref, logits_ref):
    logits_ref[...] = (
        jnp.dot(x_ref[...], wg_ref[...], preferred_element_type=jnp.float32)
        + bg_ref[...])


# -----------------------------------------------------------------------------
# Kernel 2a: conditional MLP, resident-weight path (1-D grid over token tiles).
#   h = gelu_tanh(x @ W_fc + b_fc[sel]);  y = h @ W_proj + b_proj[sel]
# Expert biases arrive pre-gathered per token (bf16 streams); weights live
# whole-array in VMEM (single-buffered).
# -----------------------------------------------------------------------------
def _mlp_kernel_resident(x_ref, bfc_ref, bproj_ref, wfc_ref, wproj_ref, y_ref,
                         *, bf16_gelu):
    h = jnp.dot(x_ref[...], wfc_ref[...], preferred_element_type=jnp.float32)
    h = h + bfc_ref[...].astype(jnp.float32)
    if bf16_gelu:
        h = h.astype(jnp.bfloat16)   # v6e/v7x: bf16 VPU/EUP halves GELU cost
    h = 0.5 * h * (1.0 + jnp.tanh(_GELU_C * (h + 0.044715 * h * h * h)))
    y = jnp.dot(h.astype(jnp.bfloat16), wproj_ref[...],
                preferred_element_type=jnp.float32)
    y_ref[...] = (y + bproj_ref[...].astype(jnp.float32)).astype(y_ref.dtype)


# -----------------------------------------------------------------------------
# Kernel 2b: conditional MLP with an H split (2-D grid: token tiles x H tiles),
# accumulating the proj matmul into an f32 scratch.  Used when the resident
# weights would crowd VMEM (large C, notably on v7x's 64 MiB VMEM).
# -----------------------------------------------------------------------------
def _mlp_kernel_hsplit(x_ref, bfc_ref, wfc_ref, wproj_ref, bproj_ref, y_ref,
                       acc_ref, *, bf16_gelu):
    @pl.when(pl.program_id(1) == 0)
    def _():
        acc_ref[...] = jnp.zeros_like(acc_ref)

    h = jnp.dot(x_ref[...], wfc_ref[...], preferred_element_type=jnp.float32)
    h = h + bfc_ref[...].astype(jnp.float32)
    if bf16_gelu:
        h = h.astype(jnp.bfloat16)
    h = 0.5 * h * (1.0 + jnp.tanh(_GELU_C * (h + 0.044715 * h * h * h)))
    acc_ref[...] += jnp.dot(h.astype(jnp.bfloat16), wproj_ref[...],
                            preferred_element_type=jnp.float32)

    @pl.when(pl.program_id(1) == pl.num_programs(1) - 1)
    def _():
        y_ref[...] = (acc_ref[...]
                      + bproj_ref[...].astype(jnp.float32)).astype(y_ref.dtype)


# -----------------------------------------------------------------------------
# VMEM estimators & tiling (last dims rounded to the 128-lane width)
# -----------------------------------------------------------------------------
def _resident_vmem_bytes(bs, C, H, out_bytes=4):
    Cp, Hp = _round_up(C, 128), _round_up(H, 128)
    streamed = 2 * bs * (2 * Cp + 2 * Hp + 2 * Cp + out_bytes * Cp)  # x, b_fc[sel], b_proj[sel], y (dbl-buffered)
    resident = 2 * Cp * Hp + 2 * Hp * Cp                             # bf16 weights, single-buffered
    live = bs * Hp * 6 + bs * Cp * 4                                 # f32 h + bf16 h + f32 y
    return streamed + resident + live


def _hsplit_vmem_bytes(bs, C, H, th, out_bytes=4):
    Cp, Tp = _round_up(C, 128), _round_up(th, 128)
    streamed = 2 * (bs * 2 * Cp            # x
                    + bs * 2 * Tp          # b_fc[sel] slab
                    + 2 * Cp * Tp          # w_fc slab
                    + 2 * Tp * Cp          # w_proj slab
                    + bs * 2 * Cp          # b_proj[sel]
                    + bs * out_bytes * Cp)  # y
    live = bs * Tp * 6 + bs * Cp * 4
    acc = bs * Cp * 4
    return streamed + live + acc


def _choose_token_tile(S, vmem_fn, budget):
    s_round = max(16, _round_up(S, 16))
    cands = [b for b in (2048, 1024, 512, 256, 128, 64, 32, 16) if b <= s_round]
    if not cands:
        cands = [s_round]
    fitting = [b for b in cands if vmem_fn(b) <= budget] or [cands[-1]]
    for b in fitting:            # prefer >=2 grid steps: shards across v7x's 2 TCs
        if 2 * b <= s_round:
            return b
    return fitting[0]


def _choose_h_tile(C, H, out_bytes, budget):
    cands = [t for t in (4096, 2048, 1024, 512, 256, 128) if t < H and H % t == 0]
    if not cands:
        return H
    for bs_target in (512, 256, 128):
        for t in cands:
            if _hsplit_vmem_bytes(bs_target, C, H, t, out_bytes) <= budget:
                return t
    return cands[-1]


# -----------------------------------------------------------------------------
# Forward wrapper
# -----------------------------------------------------------------------------
def cond_mlp_forward(x, params, cfg, key, *, h_tile=None):
    B, T, C = x.shape
    E = cfg["n_experts"]
    H = 4 * C
    S = B * T
    out_dtype = x.dtype
    out_bytes = jnp.dtype(out_dtype).itemsize

    cap = _vmem_capacity_bytes()
    budget = (2 * cap) // 3          # ~42 MiB on v7x, ~85 MiB on v5e/v6e
    bf16_gelu = _has_bf16_vpu()

    # --- pick token tile / optional H split ----------------------------------
    use_split, th = False, H
    if h_tile is not None:
        th = int(h_tile)
        use_split = 0 < th < H and H % th == 0 and th % 128 == 0
        if not use_split:
            th = H
    else:
        bs_cap = _choose_token_tile(S, lambda b: 0, budget)   # S-limited tile
        bs_res = 0
        if _resident_vmem_bytes(16, C, H, out_bytes) <= budget:
            bs_res = _choose_token_tile(
                S, lambda b: _resident_vmem_bytes(b, C, H, out_bytes), budget)
        if bs_res < min(bs_cap, 256):   # resident weights crowd VMEM (big C / v7x)
            th_try = _choose_h_tile(C, H, out_bytes, budget)
            if th_try < H:
                bs_split = _choose_token_tile(
                    S, lambda b: _hsplit_vmem_bytes(b, C, H, th_try, out_bytes),
                    budget)
                if bs_split > bs_res:
                    use_split, th = True, th_try

    if use_split:
        vmem_fn = lambda b: _hsplit_vmem_bytes(b, C, H, th, out_bytes)
    else:
        vmem_fn = lambda b: _resident_vmem_bytes(b, C, H, out_bytes)
    bs = _choose_token_tile(S, vmem_fn, budget)
    S_pad = _round_up(S, bs)
    n_tiles = S_pad // bs

    xf = x.reshape(S, C)
    xp = jnp.pad(xf, ((0, S_pad - S), (0, 0))).astype(jnp.bfloat16)

    # fold the guesser bias and the optional extra per-expert bias (the
    # reference adds both before the z-loss / softmax)
    bg = params["guesser_b"]
    if params.get("bias") is not None:
        bg = bg + params["bias"]
    bg2d = bg.reshape(1, E).astype(jnp.float32)
    wg_bf16 = params["guesser_w"].astype(jnp.bfloat16)

    # --- gate kernel (logits only; softmax/prob is tiny (S,E) glue) ----------
    logits_p = pl.pallas_call(
        _gate_kernel,
        out_shape=jax.ShapeDtypeStruct((S_pad, E), jnp.float32),
        grid_spec=pltpu.PrefetchScalarGridSpec(
            num_scalar_prefetch=0,
            grid=(n_tiles,),
            in_specs=[pl.BlockSpec((bs, C), lambda i: (i, 0)),
                      pl.BlockSpec((C, E), lambda i: (0, 0)),
                      pl.BlockSpec((1, E), lambda i: (0, 0))],
            out_specs=pl.BlockSpec((bs, E), lambda i: (i, 0))),
        compiler_params=pltpu.CompilerParams(dimension_semantics=("parallel",)),
    )(xp, wg_bf16, bg2d)
    logits = logits_p[:S]

    # --- sampling + auxiliary losses (tiny (S,E) work; plain XLA glue) -------
    prob = jax.nn.softmax(logits * _INV_TEMP, axis=-1)
    sel = jax.random.categorical(key, logits * _INV_TEMP, axis=-1)   # (S,)
    one_hot = jax.nn.one_hot(sel, E, dtype=jnp.float32)
    counts = jnp.sum(one_hot, axis=0).astype(jnp.int32)
    # TODO(synk): total_assigment_count is a mutable training-stats buffer in
    # the PyTorch module; returned here as `counts` for the caller to accumulate.

    aux = jnp.float32(0.0)
    if cfg["lambda_z"] > 0:
        lse = jax.scipy.special.logsumexp(logits, axis=-1)
        aux = aux + cfg["lambda_z"] * jnp.mean(lse ** 2)
    if cfg["w_load"] > 0:
        f_i = one_hot.mean(axis=0)
        P_i = prob.mean(axis=0)
        aux = aux + cfg["w_load"] * E * jnp.sum(f_i * P_i)
    if cfg["w_importance"] > 0:
        weights = jnp.take_along_axis(prob, sel[:, None], axis=1)
        importance = (one_hot * weights).sum(axis=0)
        mean_imp = importance.mean()
        var_imp = jnp.mean((importance - mean_imp) ** 2)   # unbiased=False
        aux = aux + cfg["w_importance"] * var_imp / (mean_imp ** 2)
    if cfg["w_penalty"] > 0:
        pm = prob.mean(axis=0)
        penalty = (jnp.mean(prob * (1.0 - prob))
                   + 1.0 / E - jnp.mean(pm * (1.0 - pm)))
        aux = aux + cfg["w_penalty"] * penalty

    # --- conditional MLP kernel -----------------------------------------------
    # pre-gather the expert biases in glue (bf16) and stream them per-token
    sel_pad = jnp.pad(sel, (0, S_pad - S))
    bfc_sel = params["b_fc"].astype(jnp.bfloat16)[sel_pad]       # (S_pad, H)
    bproj_sel = params["b_proj"].astype(jnp.bfloat16)[sel_pad]   # (S_pad, C)
    wfc_bf16 = params["w_fc"].astype(jnp.bfloat16)
    wproj_bf16 = params["w_proj"].astype(jnp.bfloat16)

    flops = 4 * S_pad * C * H
    trans = S_pad * H
    est = vmem_fn(bs)
    vmem_limit = int(min(cap - (8 << 20),
                         max(int(1.25 * est) + (4 << 20), 32 << 20)))
    vmem_limit = max(vmem_limit, 16 << 20)

    if not use_split:
        bytes_acc = (S_pad * C * 2 + S_pad * H * 2 + S_pad * C * 2
                     + 4 * C * H + S_pad * C * out_bytes)
        y_p = pl.pallas_call(
            functools.partial(_mlp_kernel_resident, bf16_gelu=bf16_gelu),
            out_shape=jax.ShapeDtypeStruct((S_pad, C), out_dtype),
            grid_spec=pltpu.PrefetchScalarGridSpec(
                num_scalar_prefetch=0,
                grid=(n_tiles,),
                in_specs=[
                    pl.BlockSpec((bs, C), lambda i: (i, 0)),
                    pl.BlockSpec((bs, H), lambda i: (i, 0)),
                    pl.BlockSpec((bs, C), lambda i: (i, 0)),
                    # grid-invariant weights: whole-array, single-buffered VMEM
                    pl.BlockSpec(memory_space=pltpu.MemorySpace.VMEM),
                    pl.BlockSpec(memory_space=pltpu.MemorySpace.VMEM),
                ],
                out_specs=pl.BlockSpec((bs, C), lambda i: (i, 0))),
            compiler_params=pltpu.CompilerParams(
                dimension_semantics=("parallel",),
                vmem_limit_bytes=vmem_limit),
            cost_estimate=pl.CostEstimate(flops=flops, transcendentals=trans,
                                          bytes_accessed=bytes_acc),
        )(xp, bfc_sel, bproj_sel, wfc_bf16, wproj_bf16)
    else:
        n_h = H // th
        bytes_acc = (S_pad * C * 2 + S_pad * H * 2 + S_pad * C * 2
                     + n_tiles * 4 * C * H + S_pad * C * out_bytes)
        y_p = pl.pallas_call(
            functools.partial(_mlp_kernel_hsplit, bf16_gelu=bf16_gelu),
            out_shape=jax.ShapeDtypeStruct((S_pad, C), out_dtype),
            grid_spec=pltpu.PrefetchScalarGridSpec(
                num_scalar_prefetch=0,
                grid=(n_tiles, n_h),
                in_specs=[
                    pl.BlockSpec((bs, C), lambda i, j: (i, 0)),
                    pl.BlockSpec((bs, th), lambda i, j: (i, j)),
                    pl.BlockSpec((C, th), lambda i, j: (0, j)),
                    pl.BlockSpec((th, C), lambda i, j: (j, 0)),
                    pl.BlockSpec((bs, C), lambda i, j: (i, 0)),
                ],
                out_specs=pl.BlockSpec((bs, C), lambda i, j: (i, 0)),
                scratch_shapes=[pltpu.VMEM((bs, C), jnp.float32)]),
            compiler_params=pltpu.CompilerParams(
                dimension_semantics=("parallel", "arbitrary"),
                vmem_limit_bytes=vmem_limit),
            cost_estimate=pl.CostEstimate(flops=flops, transcendentals=trans,
                                          bytes_accessed=bytes_acc),
        )(xp, bfc_sel, wfc_bf16, wproj_bf16, bproj_sel)

    y = y_p[:S].reshape(B, T, C)
    info = {"counts": counts, "selection": sel, "logits": logits, "prob": prob}
    return y, aux, info


# -----------------------------------------------------------------------------
# Parameter init + pure-JAX reference for the MLP path (validation)
# -----------------------------------------------------------------------------
def init_params(key, n_embd, n_experts, use_bias=True):
    C, E, H = n_embd, n_experts, 4 * n_embd
    ks = jax.random.split(key, 7)
    return {
        # stored (in, out) so kernels do x @ W
        "guesser_w": jax.random.normal(ks[0], (C, E), jnp.float32) / math.sqrt(C),
        "guesser_b": jax.random.normal(ks[1], (E,), jnp.float32) * 0.02,
        "w_fc":      jax.random.normal(ks[2], (C, H), jnp.float32) / math.sqrt(C),
        "b_fc":      jax.random.normal(ks[3], (E, H), jnp.float32) * 0.02,
        "w_proj":    jax.random.normal(ks[4], (H, C), jnp.float32) / math.sqrt(H),
        "b_proj":    jax.random.normal(ks[5], (E, C), jnp.float32) * 0.02,
        "bias":      (jax.random.normal(ks[6], (E,), jnp.float32) * 0.02
                      if use_bias else None),
    }


def _mlp_reference(x_flat, sel, params, bf16_gelu):
    xb = x_flat.astype(jnp.bfloat16)
    wfc = params["w_fc"].astype(jnp.bfloat16)
    wproj = params["w_proj"].astype(jnp.bfloat16)
    bfc = params["b_fc"].astype(jnp.bfloat16)[sel].astype(jnp.float32)
    bproj = params["b_proj"].astype(jnp.bfloat16)[sel].astype(jnp.float32)
    h = jnp.dot(xb, wfc, preferred_element_type=jnp.float32) + bfc
    if bf16_gelu:
        h = h.astype(jnp.bfloat16)
    h = 0.5 * h * (1.0 + jnp.tanh(_GELU_C * (h + 0.044715 * h * h * h)))
    y = jnp.dot(h.astype(jnp.bfloat16), wproj,
                preferred_element_type=jnp.float32) + bproj
    return y


if __name__ == "__main__":
    root = jax.random.PRNGKey(0)
    bf16_gelu = _has_bf16_vpu()

    # ---- test 1: resident-weight path ---------------------------------------
    cfg = dict(n_embd=32, n_experts=4, bias=True,
               w_importance=0.01, w_load=0.01, lambda_z=0.001, w_penalty=0.01)
    B, T, C = 2, 8, cfg["n_embd"]
    k_param, k_x, k_sel = jax.random.split(jax.random.fold_in(root, 1), 3)
    params = init_params(k_param, C, cfg["n_experts"], cfg["bias"])
    x = jax.random.normal(k_x, (B, T, C), jnp.float32)

    y, aux, info = cond_mlp_forward(x, params, cfg, k_sel)
    jax.block_until_ready((y, aux, info["counts"]))
    assert y.shape == (B, T, C)
    assert aux.shape == ()
    assert info["counts"].shape == (cfg["n_experts"],)
    y_ref = _mlp_reference(x.reshape(-1, C), info["selection"], params, bf16_gelu)
    assert jnp.allclose(y.reshape(-1, C).astype(jnp.float32), y_ref,
                        atol=5e-2, rtol=5e-2)

    # ---- test 2: H-split (accumulator) path, forced with h_tile --------------
    cfg2 = dict(n_embd=64, n_experts=4, bias=False,
                w_importance=0.01, w_load=0.01, lambda_z=0.001, w_penalty=0.01)
    B2, T2, C2 = 2, 8, cfg2["n_embd"]
    k_param2, k_x2, k_sel2 = jax.random.split(jax.random.fold_in(root, 2), 3)
    params2 = init_params(k_param2, C2, cfg2["n_experts"], cfg2["bias"])
    x2 = jax.random.normal(k_x2, (B2, T2, C2), jnp.float32)

    y2, aux2, info2 = cond_mlp_forward(x2, params2, cfg2, k_sel2, h_tile=128)
    jax.block_until_ready((y2, aux2))
    assert y2.shape == (B2, T2, C2)
    y2_ref = _mlp_reference(x2.reshape(-1, C2), info2["selection"], params2,
                            bf16_gelu)
    assert jnp.allclose(y2.reshape(-1, C2).astype(jnp.float32), y2_ref,
                        atol=5e-2, rtol=5e-2)

    print("KERNEL_OK")
</pallas_src>

<mosaic_0001>
module attributes {stable_mosaic.version = 11 : i64} {
  func.func @_gate_kernel(%arg0: i32, %arg1: memref<16x32xbf16, #tpu.memory_space<vmem>>, %arg2: memref<32x4xbf16, #tpu.memory_space<vmem>>, %arg3: memref<1x4xf32, #tpu.memory_space<vmem>>, %arg4: memref<16x4xf32, #tpu.memory_space<vmem>>) attributes {dimension_semantics = [#tpu.dimension_semantics<parallel>], iteration_bounds = array<i64: 1>, scalar_prefetch = 0 : i64, scratch_operands = 0 : i64, tpu.core_type = #tpu.core_type<tc>, window_params = [{transform_indices = @transform_0, window_bounds = array<i64: 16, 32>}, {pipeline_mode = #tpu.pipeline_mode<synchronous>, transform_indices = @transform_1, window_bounds = array<i64: 32, 4>}, {pipeline_mode = #tpu.pipeline_mode<synchronous>, transform_indices = @transform_2, window_bounds = array<i64: 1, 4>}, {transform_indices = @transform_3, window_bounds = array<i64: 16, 4>}]} {
    %c0 = arith.constant 0 : index
    %c0_0 = arith.constant 0 : index
    %0 = vector.load %arg1[%c0, %c0_0] : memref<16x32xbf16, #tpu.memory_space<vmem>>, vector<16x32xbf16>
    %c0_1 = arith.constant 0 : index
    %c0_2 = arith.constant 0 : index
    %1 = vector.load %arg2[%c0_1, %c0_2] : memref<32x4xbf16, #tpu.memory_space<vmem>>, vector<32x4xbf16>
    %cst = arith.constant dense<0.000000e+00> : vector<16x4xf32>
    %2 = tpu.matmul %0, %1, %cst {dimension_numbers = #tpu.dot_dimension_numbers<[1], [0], [0], [1], [0, 0, 1, 1], [], []>} : vector<16x32xbf16>, vector<32x4xbf16>, vector<16x4xf32> -> vector<16x4xf32>
    %c0_3 = arith.constant 0 : index
    %c0_4 = arith.constant 0 : index
    %3 = vector.load %arg3[%c0_3, %c0_4] : memref<1x4xf32, #tpu.memory_space<vmem>>, vector<1x4xf32>
    %4 = vector.broadcast %3 : vector<1x4xf32> to vector<16x4xf32>
    %5 = arith.addf %2, %4 : vector<16x4xf32>
    %c0_5 = arith.constant 0 : index
    %c0_6 = arith.constant 0 : index
    %6 = vector.load %arg4[%c0_5, %c0_6] : memref<16x4xf32, #tpu.memory_space<vmem>>, vector<16x4xf32>
    tpu.vector_store %arg4[%c0_5, %c0_6], %5 {strides = array<i32>} : memref<16x4xf32, #tpu.memory_space<vmem>>, vector<16x4xf32>,
    return
  }
  func.func @transform_0(%arg0: i32) -> (i32, i32) {
    %c0_i32 = arith.constant 0 : i32
    %c0_i32_0 = arith.constant 0 : i32
    return %arg0, %c0_i32 : i32, i32
  }
  func.func @transform_1(%arg0: i32) -> (i32, i32) {
    %c0_i32 = arith.constant 0 : i32
    %c0_i32_0 = arith.constant 0 : i32
    %c0_i32_1 = arith.constant 0 : i32
    return %c0_i32, %c0_i32_0 : i32, i32
  }
  func.func @transform_2(%arg0: i32) -> (i32, i32) {
    %c0_i32 = arith.constant 0 : i32
    %c0_i32_0 = arith.constant 0 : i32
    %c0_i32_1 = arith.constant 0 : i32
    return %c0_i32, %c0_i32_0 : i32, i32
  }
  func.func @transform_3(%arg0: i32) -> (i32, i32) {
    %c0_i32 = arith.constant 0 : i32
    %c0_i32_0 = arith.constant 0 : i32
    return %arg0, %c0_i32 : i32, i32
  }
}

</mosaic_0001>

<bundles_post_ra>
// kernel: tpu_custom_call.1
= control target key start
LH: loop header
LB: loop body
LE: loop exit
PB: predicated region body
PF: predicated region fallthrough
CT: control target
= control target key end

     0   :  { %v118_v0 = vmov 0.0   ;;  %vm119_vm0 = vmmov 0   ;;  %vm45_vm1 = vcmask 261120   ;;  %vm90_vm2 = vcmask 31744   ;;  %s158_s1 = inlined_call_operand.vmem [shape: bf16[32,4], index: 1, kind: input, shape index: {}]   ;;  %s159_s0 = inlined_call_operand.vmem [shape: bf16[16,32], index: 0, kind: input, shape index: {}]   ;;  %s160_s2 = inlined_call_operand.vmem [shape: f32[1,4], index: 2, kind: input, shape index: {}]   ;;  %s161_s3 = inlined_call_operand.vmem [shape: f32[16,4], index: 3, kind: output, shape index: {}]  }
   0x1   :  { %105 = vmatprep.subr.bf16.mxu0 %v118_v0  ;;  %v115_v1 = vld [vmem:[%s158_s1] sm:$0xff]   ;;  %109 = vmatprep.mubr.msk.bf16.mxu0 %vm119_vm0, %v118_v0  ;;  %v116_v2 = vld [vmem:[%s158_s1 + $0x8] sm:$0xff]  }
   0x2   :  { %106 = vmatpush3.bf16.msra.mxu0 %v115_v1  ;;  %v117_v3 = vld [vmem:[%s159_s0] sm:$0xff]  }
   0x3   :  { %107 = vmatprep.subr.bf16.mxu0 %v118_v0  ;;  %v97_v4 = vld [vmem:[%s160_s2] ss:$0 sm:$0xff] }
   0x6   :  { %108 = vmatpush3.bf16.msra.mxu0 %v116_v2 }
   0x9   :  { %110 = vmatmul.mubr.msk.bf16.vlgmr.msra.gmra.mrb[0].mxu0 %vm45_vm1, %v117_v3 }
  0xdc   :  { %v83_v5 = vpop.f32.mrb[0].mxu0 }
  0xdd   :  { %v84_v6 = vadd.f32 %v97_v4, %v83_v5  ;;  %v111_v7 = vpop.f32.mrb[1].mxu0 }
  0xde   :  { %v86_v8 = vpop.f32.mrb[2].mxu0 }
  0xdf   :  { %91 = vst.msk [vmem:[%s161_s3] sm:$0xff] %vm90_vm2, %v84_v6  ;;  %v87_v9 = vadd.f32 %v97_v4, %v86_v8  ;;  %v112_v10 = vpop.f32.mrb[3].mxu0 }
  0xe1   :  { %92 = vst.msk [vmem:[%s161_s3 + $0x8] sm:$0xff] %vm90_vm2, %v87_v9 }

</bundles_post_ra>
